<compile_context>
chip_gen: v7x
topology: tpu7x:2x2x1
jax: 0.10.0
libtpu: 0.0.40
codegen_flags: <defaults>
</compile_context>

<pallas_src>
import functools

import jax
import jax.numpy as jnp
from jax import lax
from jax.experimental import pallas as pl
from jax.experimental.pallas import tpu as pltpu


# ----------------------------------------------------------------------------
# Pallas kernel: one (direction, time-block) step of the bidirectional LSTM.
# ----------------------------------------------------------------------------
def _bilstm_block_kernel(xs_ref, wih_ref, whh_ref, b_ref, out_ref,
                         h_scr, c_scr, gx_scr, *,
                         hidden, time_block, batch):
    """xs_ref : (TT*B, 2C)  time-major input rows for this block (matmul dtype)
    wih_ref: (2C, 4H)     input weights, pre-transposed, this direction
    whh_ref: (H, 4H)      recurrent weights, pre-transposed, this direction
    b_ref  : (1, 4H)      combined bias (b_ih + b_hh), f32
    out_ref: (TT*B, H)    hidden states for this block (f32)
    h_scr  : (B, H) f32   recurrent hidden state (carried across time blocks)
    c_scr  : (B, H) f32   recurrent cell state
    gx_scr : (TT*B, 4H)   f32 block-wide input-projection buffer
    """
    t = pl.program_id(1)          # time-block index (sequential axis)
    H, TT, B = hidden, time_block, batch

    @pl.when(t == 0)
    def _():
        h_scr[...] = jnp.zeros_like(h_scr)
        c_scr[...] = jnp.zeros_like(c_scr)

    # Fused input projection for the whole block: one big MXU matmul per grid
    # step (M-dim = TT*B), f32 accumulation, bias folded in.
    gx_scr[...] = (
        jnp.dot(xs_ref[...], wih_ref[...], preferred_element_type=jnp.float32)
        + b_ref[...])

    whh = whh_ref[...]            # (H, 4H), resident for the whole block
    mm_dtype = whh.dtype

    def step(s, carry):
        row = s * B
        if B % 8 == 0:            # static Python check (B is a trace-time int)
            row = pl.multiple_of(row, 8)

        gx = gx_scr[pl.ds(row, B), :]                       # dense (B, 4H) load
        h = h_scr[...]
        # Only the small recurrent matmul remains inside the sequential loop.
        gates = gx + jnp.dot(h.astype(mm_dtype), whh,
                             preferred_element_type=jnp.float32)

        # PyTorch gate order: i, f, g, o.  (For production H, keep H a
        # multiple of 128 so these slices are aligned vreg selects.)
        i = jax.nn.sigmoid(gates[:, 0 * H:1 * H])
        f = jax.nn.sigmoid(gates[:, 1 * H:2 * H])
        g = jnp.tanh(gates[:, 2 * H:3 * H])
        o = jax.nn.sigmoid(gates[:, 3 * H:4 * H])

        c_new = f * c_scr[...] + i * g
        h_new = o * jnp.tanh(c_new)

        c_scr[...] = c_new
        h_scr[...] = h_new
        # Time-major layout makes this a dense (B, H) store; padded rows are
        # sliced off in the wrapper.
        out_ref[pl.ds(row, B), :] = h_new.astype(out_ref.dtype)
        return carry

    # Partial unroll: amortizes loop overhead without blowing up code size.
    lax.fori_loop(0, TT, step, 0, unroll=min(TT, 8))


# ----------------------------------------------------------------------------
# PBLSTMPad forward (eval mode)
# ----------------------------------------------------------------------------
def pblstm_pad_forward(x, params, *, time_block=16, matmul_dtype=jnp.bfloat16):
    """x: (B, T, C) -> (B, T//2, 2*hidden_dim)."""
    B, T, C = x.shape
    T2 = T // 2
    x2 = x[:, :2 * T2, :].reshape(B, T2, 2 * C).astype(jnp.float32)

    # LockedDropOut: identity in eval mode.
    # TODO(synk): training-mode LockedDropOut (shared Bernoulli mask over T)
    # not implemented; eval semantics reproduced exactly.

    H = params["w_hh_f"].shape[1]
    C2 = 2 * C
    TT = max(1, min(time_block, T2))
    NT = pl.cdiv(T2, TT)
    Tp = NT * TT

    # Time-major layout so every per-step access in the kernel is a contiguous
    # (B, .) slab.  Pre-reverse the backward direction so BOTH directions run
    # forward in kernel time (no in-kernel index reversal, and padded frames
    # are only processed after all valid frames -> no per-step valid masking).
    x_t = jnp.transpose(x2, (1, 0, 2))                       # (T2, B, 2C)
    xs = jnp.stack([x_t, jnp.flip(x_t, axis=0)])             # (2, T2, B, 2C)
    xs = jnp.pad(xs, ((0, 0), (0, Tp - T2), (0, 0), (0, 0))) # (2, Tp, B, 2C)
    xs = xs.reshape(2, NT, TT * B, C2).astype(matmul_dtype)  # pre-blocked

    # Pre-transposed weights (no per-step .T in kernel); bf16 matmul operands.
    w_ih = jnp.stack([params["w_ih_f"].T, params["w_ih_b"].T]).astype(matmul_dtype)  # (2,2C,4H)
    w_hh = jnp.stack([params["w_hh_f"].T, params["w_hh_b"].T]).astype(matmul_dtype)  # (2,H,4H)
    bias = jnp.stack([params["b_f"], params["b_b"]]).astype(jnp.float32)             # (2,1,4H)

    # Explicit VMEM budget (double-buffered in/out blocks + weights + scratch),
    # clamped so it also fits v7x's 64 MiB physical VMEM.
    itm = jnp.dtype(matmul_dtype).itemsize
    est = (2 * (TT * B * C2 * itm + TT * B * H * 4)               # xs/out blocks
           + 2 * ((C2 + H) * 4 * H * itm + 4 * H * 4)             # weights + bias
           + 2 * B * H * 4 + TT * B * 4 * H * 4)                  # h/c/gx scratch
    vmem_limit = int(min(max(2 * est + (4 << 20), 32 << 20), 48 << 20))

    kernel = functools.partial(_bilstm_block_kernel,
                               hidden=H, time_block=TT, batch=B)

    out = pl.pallas_call(
        kernel,
        out_shape=jax.ShapeDtypeStruct((2, NT, TT * B, H), jnp.float32),
        grid_spec=pltpu.PrefetchScalarGridSpec(
            num_scalar_prefetch=0,
            grid=(2, NT),
            in_specs=[
                pl.BlockSpec((None, None, TT * B, C2),
                             lambda d, t: (d, t, 0, 0)),          # xs block
                pl.BlockSpec((None, C2, 4 * H),
                             lambda d, t: (d, 0, 0)),             # W_ih^T
                pl.BlockSpec((None, H, 4 * H),
                             lambda d, t: (d, 0, 0)),             # W_hh^T
                pl.BlockSpec((None, 1, 4 * H),
                             lambda d, t: (d, 0, 0)),             # bias
            ],
            out_specs=pl.BlockSpec((None, None, TT * B, H),
                                   lambda d, t: (d, t, 0, 0)),
            scratch_shapes=[
                pltpu.VMEM((B, H), jnp.float32),                  # h state
                pltpu.VMEM((B, H), jnp.float32),                  # c state
                pltpu.VMEM((TT * B, 4 * H), jnp.float32),         # gx block
            ],
        ),
        compiler_params=pltpu.CompilerParams(
            # direction axis -> both TensorCores on v7x; time axis carries the
            # recurrence through h/c scratch and must stay sequential.
            dimension_semantics=("parallel", "arbitrary"),
            vmem_limit_bytes=vmem_limit,
        ),
    )(xs, w_ih, w_hh, bias)

    out = out.reshape(2, Tp, B, H)[:, :T2]                   # drop time padding
    h_f = out[0]                                             # (T2, B, H)
    h_b = jnp.flip(out[1], axis=0)                           # undo pre-reversal
    res = jnp.concatenate([h_f, h_b], axis=-1)               # (T2, B, 2H)
    # PyTorch bidirectional layout: [..., :H] forward, [..., H:] backward.
    return jnp.transpose(res, (1, 0, 2))                     # (B, T2, 2H)


# ----------------------------------------------------------------------------
# Pure-JAX reference (correctness check)
# ----------------------------------------------------------------------------
def _lstm_ref(x_tm, w_ih, w_hh, b):
    H = w_hh.shape[1]
    B = x_tm.shape[1]

    def step(carry, xt):
        h, c = carry
        gates = xt @ w_ih.T + h @ w_hh.T + b[0]
        i = jax.nn.sigmoid(gates[:, :H])
        f = jax.nn.sigmoid(gates[:, H:2 * H])
        g = jnp.tanh(gates[:, 2 * H:3 * H])
        o = jax.nn.sigmoid(gates[:, 3 * H:])
        c = f * c + i * g
        h = o * jnp.tanh(c)
        return (h, c), h

    init = (jnp.zeros((B, H), jnp.float32), jnp.zeros((B, H), jnp.float32))
    _, hs = jax.lax.scan(step, init, x_tm)
    return hs


def pblstm_pad_ref(x, params):
    B, T, C = x.shape
    if T % 2 == 1:
        x = x[:, :-1, :]
        T = T - 1
    x = x.reshape(B, T // 2, 2 * C)
    x_tm = jnp.transpose(x, (1, 0, 2)).astype(jnp.float32)
    h_f = _lstm_ref(x_tm, params["w_ih_f"], params["w_hh_f"], params["b_f"])
    h_b = jnp.flip(
        _lstm_ref(jnp.flip(x_tm, 0), params["w_ih_b"], params["w_hh_b"], params["b_b"]), 0
    )
    return jnp.transpose(jnp.concatenate([h_f, h_b], -1), (1, 0, 2))


# ----------------------------------------------------------------------------
# Deterministic parameter init (PyTorch-style uniform(-1/sqrt(H), 1/sqrt(H)))
# ----------------------------------------------------------------------------
def init_params(key, input_dim, hidden_dim):
    d_in = input_dim * 2
    k = 1.0 / jnp.sqrt(hidden_dim)
    keys = jax.random.split(key, 8)

    def u(kk, shape):
        return jax.random.uniform(kk, shape, jnp.float32, -k, k)

    return {
        # forward direction
        "w_ih_f": u(keys[0], (4 * hidden_dim, d_in)),
        "w_hh_f": u(keys[1], (4 * hidden_dim, hidden_dim)),
        "b_f": (u(keys[2], (1, 4 * hidden_dim)) + u(keys[3], (1, 4 * hidden_dim))),
        # backward direction
        "w_ih_b": u(keys[4], (4 * hidden_dim, d_in)),
        "w_hh_b": u(keys[5], (4 * hidden_dim, hidden_dim)),
        "b_b": (u(keys[6], (1, 4 * hidden_dim)) + u(keys[7], (1, 4 * hidden_dim))),
    }


if __name__ == "__main__":
    # Small shapes consistent with the module: x is (B, T, C); input_dim = C.
    B, T, C = 2, 9, 4          # T odd -> exercises the truncation path
    hidden_dim = 32

    key = jax.random.PRNGKey(0)
    k_x, k_p = jax.random.split(key)
    x = jax.random.normal(k_x, (B, T, C), dtype=jnp.float32)
    params = init_params(k_p, input_dim=C, hidden_dim=hidden_dim)

    ref = pblstm_pad_ref(x, params)

    # f32 matmul operands: tight check against the pure-JAX reference.
    out_f32 = jax.jit(functools.partial(pblstm_pad_forward,
                                        matmul_dtype=jnp.float32))(x, params)
    out_f32 = jax.block_until_ready(out_f32)
    assert out_f32.shape == (B, T // 2, 2 * hidden_dim), out_f32.shape
    assert jnp.allclose(out_f32, ref, atol=1e-4, rtol=1e-4), "f32 mismatch vs reference"

    # bf16 matmul operands (default / production path): looser tolerance.
    out_bf16 = jax.jit(pblstm_pad_forward)(x, params)
    out_bf16 = jax.block_until_ready(out_bf16)
    assert out_bf16.shape == (B, T // 2, 2 * hidden_dim), out_bf16.shape
    assert jnp.allclose(out_bf16, ref, atol=3e-2, rtol=3e-2), "bf16 mismatch vs reference"

    print("KERNEL_OK")
</pallas_src>

<mosaic_0001>
module attributes {stable_mosaic.version = 11 : i64} {
  func.func @_bilstm_block_kernel(%arg0: i32, %arg1: i32, %arg2: memref<1x1x8x8xf32, #tpu.memory_space<vmem>>, %arg3: memref<1x8x128xf32, #tpu.memory_space<vmem>>, %arg4: memref<1x32x128xf32, #tpu.memory_space<vmem>>, %arg5: memref<1x1x128xf32, #tpu.memory_space<vmem>>, %arg6: memref<1x1x8x32xf32, #tpu.memory_space<vmem>>, %arg7: memref<2x32xf32, #tpu.memory_space<vmem>>, %arg8: memref<2x32xf32, #tpu.memory_space<vmem>>, %arg9: memref<8x128xf32, #tpu.memory_space<vmem>>) attributes {dimension_semantics = [#tpu.dimension_semantics<parallel>, #tpu.dimension_semantics<arbitrary>], iteration_bounds = array<i64: 2, 1>, scalar_prefetch = 0 : i64, scratch_operands = 3 : i64, tpu.core_type = #tpu.core_type<tc>, window_params = [{transform_indices = @transform_0, window_bounds = array<i64: 1, 1, 8, 8>}, {transform_indices = @transform_1, window_bounds = array<i64: 1, 8, 128>}, {transform_indices = @transform_2, window_bounds = array<i64: 1, 32, 128>}, {transform_indices = @transform_3, window_bounds = array<i64: 1, 1, 128>}, {transform_indices = @transform_4, window_bounds = array<i64: 1, 1, 8, 32>}]} {
    %c0_i32 = arith.constant 0 : i32
    %0 = arith.cmpi eq, %arg1, %c0_i32 : i32
    %1 = arith.extui %0 : i1 to i32
    %c0_i32_0 = arith.constant 0 : i32
    %2 = arith.cmpi ne, %1, %c0_i32_0 : i32
    scf.if %2 {
      %cst_84 = arith.constant 0.000000e+00 : f32
      %167 = vector.broadcast %cst_84 : f32 to vector<2x32xf32>
      %c0_85 = arith.constant 0 : index
      %c0_86 = arith.constant 0 : index
      %168 = vector.load %arg7[%c0_85, %c0_86] : memref<2x32xf32, #tpu.memory_space<vmem>>, vector<2x32xf32>
      tpu.vector_store %arg7[%c0_85, %c0_86], %167 {strides = array<i32>} : memref<2x32xf32, #tpu.memory_space<vmem>>, vector<2x32xf32>,
      %cst_87 = arith.constant 0.000000e+00 : f32
      %169 = vector.broadcast %cst_87 : f32 to vector<2x32xf32>
      %c0_88 = arith.constant 0 : index
      %c0_89 = arith.constant 0 : index
      %170 = vector.load %arg8[%c0_88, %c0_89] : memref<2x32xf32, #tpu.memory_space<vmem>>, vector<2x32xf32>
      tpu.vector_store %arg8[%c0_88, %c0_89], %169 {strides = array<i32>} : memref<2x32xf32, #tpu.memory_space<vmem>>, vector<2x32xf32>,
    } else {
    }
    %c0 = arith.constant 0 : index
    %c0_1 = arith.constant 0 : index
    %c0_2 = arith.constant 0 : index
    %c0_3 = arith.constant 0 : index
    %3 = vector.load %arg2[%c0, %c0_1, %c0_2, %c0_3] : memref<1x1x8x8xf32, #tpu.memory_space<vmem>>, vector<1x1x8x8xf32>
    %4 = vector.shape_cast %3 : vector<1x1x8x8xf32> to vector<8x8xf32>
    %c0_4 = arith.constant 0 : index
    %c0_5 = arith.constant 0 : index
    %c0_6 = arith.constant 0 : index
    %5 = vector.load %arg3[%c0_4, %c0_5, %c0_6] : memref<1x8x128xf32, #tpu.memory_space<vmem>>, vector<1x8x128xf32>
    %6 = vector.shape_cast %5 : vector<1x8x128xf32> to vector<8x128xf32>
    %cst = arith.constant dense<0.000000e+00> : vector<8x128xf32>
    %7 = tpu.matmul %4, %6, %cst {dimension_numbers = #tpu.dot_dimension_numbers<[1], [0], [0], [1], [0, 0, 1, 1], [], []>} : vector<8x8xf32>, vector<8x128xf32>, vector<8x128xf32> -> vector<8x128xf32>
    %c0_7 = arith.constant 0 : index
    %c0_8 = arith.constant 0 : index
    %c0_9 = arith.constant 0 : index
    %8 = vector.load %arg5[%c0_7, %c0_8, %c0_9] : memref<1x1x128xf32, #tpu.memory_space<vmem>>, vector<1x1x128xf32>
    %9 = vector.shape_cast %8 : vector<1x1x128xf32> to vector<1x128xf32>
    %10 = vector.broadcast %9 : vector<1x128xf32> to vector<8x128xf32>
    %11 = arith.addf %7, %10 : vector<8x128xf32>
    %c0_10 = arith.constant 0 : index
    %c0_11 = arith.constant 0 : index
    %12 = vector.load %arg9[%c0_10, %c0_11] : memref<8x128xf32, #tpu.memory_space<vmem>>, vector<8x128xf32>
    tpu.vector_store %arg9[%c0_10, %c0_11], %11 {strides = array<i32>} : memref<8x128xf32, #tpu.memory_space<vmem>>, vector<8x128xf32>,
    %c0_12 = arith.constant 0 : index
    %c0_13 = arith.constant 0 : index
    %c0_14 = arith.constant 0 : index
    %13 = vector.load %arg4[%c0_12, %c0_13, %c0_14] : memref<1x32x128xf32, #tpu.memory_space<vmem>>, vector<1x32x128xf32>
    %14 = vector.shape_cast %13 : vector<1x32x128xf32> to vector<32x128xf32>
    %c0_i32_15 = arith.constant 0 : i32
    %c2_i32 = arith.constant 2 : i32
    %15 = arith.muli %c0_i32_15, %c2_i32 : i32
    %16 = arith.index_cast %15 : i32 to index
    %c0_16 = arith.constant 0 : index
    %17 = vector.load %arg9[%16, %c0_16] : memref<8x128xf32, #tpu.memory_space<vmem>>, vector<2x128xf32>
    %c0_17 = arith.constant 0 : index
    %c0_18 = arith.constant 0 : index
    %18 = vector.load %arg7[%c0_17, %c0_18] : memref<2x32xf32, #tpu.memory_space<vmem>>, vector<2x32xf32>
    %cst_19 = arith.constant dense<0.000000e+00> : vector<2x128xf32>
    %19 = tpu.matmul %18, %14, %cst_19 {dimension_numbers = #tpu.dot_dimension_numbers<[1], [0], [0], [1], [0, 0, 1, 1], [], []>} : vector<2x32xf32>, vector<32x128xf32>, vector<2x128xf32> -> vector<2x128xf32>
    %20 = arith.addf %17, %19 : vector<2x128xf32>
    %21 = vector.extract_strided_slice %20 {offsets = [0, 0], sizes = [2, 32], strides = [1, 1]} : vector<2x128xf32> to vector<2x32xf32>
    %22 = arith.negf %21 : vector<2x32xf32>
    %23 = math.exp %22 : vector<2x32xf32>
    %cst_20 = arith.constant 1.000000e+00 : f32
    %24 = vector.broadcast %cst_20 : f32 to vector<2x32xf32>
    %25 = arith.addf %24, %23 : vector<2x32xf32>
    %26 = arith.divf %24, %25 : vector<2x32xf32>
    %27 = vector.extract_strided_slice %20 {offsets = [0, 32], sizes = [2, 32], strides = [1, 1]} : vector<2x128xf32> to vector<2x32xf32>
    %28 = arith.negf %27 : vector<2x32xf32>
    %29 = math.exp %28 : vector<2x32xf32>
    %cst_21 = arith.constant 1.000000e+00 : f32
    %30 = vector.broadcast %cst_21 : f32 to vector<2x32xf32>
    %31 = arith.addf %30, %29 : vector<2x32xf32>
    %32 = arith.divf %30, %31 : vector<2x32xf32>
    %33 = vector.extract_strided_slice %20 {offsets = [0, 64], sizes = [2, 32], strides = [1, 1]} : vector<2x128xf32> to vector<2x32xf32>
    %34 = math.tanh %33 : vector<2x32xf32>
    %35 = vector.extract_strided_slice %20 {offsets = [0, 96], sizes = [2, 32], strides = [1, 1]} : vector<2x128xf32> to vector<2x32xf32>
    %36 = arith.negf %35 : vector<2x32xf32>
    %37 = math.exp %36 : vector<2x32xf32>
    %cst_22 = arith.constant 1.000000e+00 : f32
    %38 = vector.broadcast %cst_22 : f32 to vector<2x32xf32>
    %39 = arith.addf %38, %37 : vector<2x32xf32>
    %40 = arith.divf %38, %39 : vector<2x32xf32>
    %c0_23 = arith.constant 0 : index
    %c0_24 = arith.constant 0 : index
    %41 = vector.load %arg8[%c0_23, %c0_24] : memref<2x32xf32, #tpu.memory_space<vmem>>, vector<2x32xf32>
    %42 = arith.mulf %32, %41 : vector<2x32xf32>
    %43 = arith.mulf %26, %34 : vector<2x32xf32>
    %44 = arith.addf %42, %43 : vector<2x32xf32>
    %45 = math.tanh %44 : vector<2x32xf32>
    %46 = arith.mulf %40, %45 : vector<2x32xf32>
    %c0_25 = arith.constant 0 : index
    %c0_26 = arith.constant 0 : index
    %47 = vector.load %arg8[%c0_25, %c0_26] : memref<2x32xf32, #tpu.memory_space<vmem>>, vector<2x32xf32>
    tpu.vector_store %arg8[%c0_25, %c0_26], %44 {strides = array<i32>} : memref<2x32xf32, #tpu.memory_space<vmem>>, vector<2x32xf32>,
    %c0_27 = arith.constant 0 : index
    %c0_28 = arith.constant 0 : index
    %48 = vector.load %arg7[%c0_27, %c0_28] : memref<2x32xf32, #tpu.memory_space<vmem>>, vector<2x32xf32>
    tpu.vector_store %arg7[%c0_27, %c0_28], %46 {strides = array<i32>} : memref<2x32xf32, #tpu.memory_space<vmem>>, vector<2x32xf32>,
    %c0_29 = arith.constant 0 : index
    %c0_30 = arith.constant 0 : index
    %49 = arith.index_cast %15 : i32 to index
    %c0_31 = arith.constant 0 : index
    %50 = vector.load %arg6[%c0_29, %c0_30, %49, %c0_31] : memref<1x1x8x32xf32, #tpu.memory_space<vmem>>, vector<1x1x2x32xf32>
    %51 = vector.shape_cast %50 : vector<1x1x2x32xf32> to vector<2x32xf32>
    %52 = vector.shape_cast %46 : vector<2x32xf32> to vector<1x1x2x32xf32>
    tpu.vector_store %arg6[%c0_29, %c0_30, %49, %c0_31], %52 {strides = array<i32>} : memref<1x1x8x32xf32, #tpu.memory_space<vmem>>, vector<1x1x2x32xf32>,
    %c1_i32 = arith.constant 1 : i32
    %c2_i32_32 = arith.constant 2 : i32
    %53 = arith.muli %c1_i32, %c2_i32_32 : i32
    %54 = arith.index_cast %53 : i32 to index
    %c0_33 = arith.constant 0 : index
    %55 = vector.load %arg9[%54, %c0_33] : memref<8x128xf32, #tpu.memory_space<vmem>>, vector<2x128xf32>
    %c0_34 = arith.constant 0 : index
    %c0_35 = arith.constant 0 : index
    %56 = vector.load %arg7[%c0_34, %c0_35] : memref<2x32xf32, #tpu.memory_space<vmem>>, vector<2x32xf32>
    %cst_36 = arith.constant dense<0.000000e+00> : vector<2x128xf32>
    %57 = tpu.matmul %56, %14, %cst_36 {dimension_numbers = #tpu.dot_dimension_numbers<[1], [0], [0], [1], [0, 0, 1, 1], [], []>} : vector<2x32xf32>, vector<32x128xf32>, vector<2x128xf32> -> vector<2x128xf32>
    %58 = arith.addf %55, %57 : vector<2x128xf32>
    %59 = vector.extract_strided_slice %58 {offsets = [0, 0], sizes = [2, 32], strides = [1, 1]} : vector<2x128xf32> to vector<2x32xf32>
    %60 = arith.negf %59 : vector<2x32xf32>
    %61 = math.exp %60 : vector<2x32xf32>
    %cst_37 = arith.constant 1.000000e+00 : f32
    %62 = vector.broadcast %cst_37 : f32 to vector<2x32xf32>
    %63 = arith.addf %62, %61 : vector<2x32xf32>
    %64 = arith.divf %62, %63 : vector<2x32xf32>
    %65 = vector.extract_strided_slice %58 {offsets = [0, 32], sizes = [2, 32], strides = [1, 1]} : vector<2x128xf32> to vector<2x32xf32>
    %66 = arith.negf %65 : vector<2x32xf32>
    %67 = math.exp %66 : vector<2x32xf32>
    %cst_38 = arith.constant 1.000000e+00 : f32
    %68 = vector.broadcast %cst_38 : f32 to vector<2x32xf32>
    %69 = arith.addf %68, %67 : vector<2x32xf32>
    %70 = arith.divf %68, %69 : vector<2x32xf32>
    %71 = vector.extract_strided_slice %58 {offsets = [0, 64], sizes = [2, 32], strides = [1, 1]} : vector<2x128xf32> to vector<2x32xf32>
    %72 = math.tanh %71 : vector<2x32xf32>
    %73 = vector.extract_strided_slice %58 {offsets = [0, 96], sizes = [2, 32], strides = [1, 1]} : vector<2x128xf32> to vector<2x32xf32>
    %74 = arith.negf %73 : vector<2x32xf32>
    %75 = math.exp %74 : vector<2x32xf32>
    %cst_39 = arith.constant 1.000000e+00 : f32
    %76 = vector.broadcast %cst_39 : f32 to vector<2x32xf32>
    %77 = arith.addf %76, %75 : vector<2x32xf32>
    %78 = arith.divf %76, %77 : vector<2x32xf32>
    %c0_40 = arith.constant 0 : index
    %c0_41 = arith.constant 0 : index
    %79 = vector.load %arg8[%c0_40, %c0_41] : memref<2x32xf32, #tpu.memory_space<vmem>>, vector<2x32xf32>
    %80 = arith.mulf %70, %79 : vector<2x32xf32>
    %81 = arith.mulf %64, %72 : vector<2x32xf32>
    %82 = arith.addf %80, %81 : vector<2x32xf32>
    %83 = math.tanh %82 : vector<2x32xf32>
    %84 = arith.mulf %78, %83 : vector<2x32xf32>
    %c0_42 = arith.constant 0 : index
    %c0_43 = arith.constant 0 : index
    %85 = vector.load %arg8[%c0_42, %c0_43] : memref<2x32xf32, #tpu.memory_space<vmem>>, vector<2x32xf32>
    tpu.vector_store %arg8[%c0_42, %c0_43], %82 {strides = array<i32>} : memref<2x32xf32, #tpu.memory_space<vmem>>, vector<2x32xf32>,
    %c0_44 = arith.constant 0 : index
    %c0_45 = arith.constant 0 : index
    %86 = vector.load %arg7[%c0_44, %c0_45] : memref<2x32xf32, #tpu.memory_space<vmem>>, vector<2x32xf32>
    tpu.vector_store %arg7[%c0_44, %c0_45], %84 {strides = array<i32>} : memref<2x32xf32, #tpu.memory_space<vmem>>, vector<2x32xf32>,
    %c0_46 = arith.constant 0 : index
    %c0_47 = arith.constant 0 : index
    %87 = arith.index_cast %53 : i32 to index
    %c0_48 = arith.constant 0 : index
    %88 = vector.load %arg6[%c0_46, %c0_47, %87, %c0_48] : memref<1x1x8x32xf32, #tpu.memory_space<vmem>>, vector<1x1x2x32xf32>
    %89 = vector.shape_cast %88 : vector<1x1x2x32xf32> to vector<2x32xf32>
    %90 = vector.shape_cast %84 : vector<2x32xf32> to vector<1x1x2x32xf32>
    tpu.vector_store %arg6[%c0_46, %c0_47, %87, %c0_48], %90 {strides = array<i32>} : memref<1x1x8x32xf32, #tpu.memory_space<vmem>>, vector<1x1x2x32xf32>,
    %c2_i32_49 = arith.constant 2 : i32
    %c2_i32_50 = arith.constant 2 : i32
    %91 = arith.muli %c2_i32_49, %c2_i32_50 : i32
    %92 = arith.index_cast %91 : i32 to index
    %c0_51 = arith.constant 0 : index
    %93 = vector.load %arg9[%92, %c0_51] : memref<8x128xf32, #tpu.memory_space<vmem>>, vector<2x128xf32>
    %c0_52 = arith.constant 0 : index
    %c0_53 = arith.constant 0 : index
    %94 = vector.load %arg7[%c0_52, %c0_53] : memref<2x32xf32, #tpu.memory_space<vmem>>, vector<2x32xf32>
    %cst_54 = arith.constant dense<0.000000e+00> : vector<2x128xf32>
    %95 = tpu.matmul %94, %14, %cst_54 {dimension_numbers = #tpu.dot_dimension_numbers<[1], [0], [0], [1], [0, 0, 1, 1], [], []>} : vector<2x32xf32>, vector<32x128xf32>, vector<2x128xf32> -> vector<2x128xf32>
    %96 = arith.addf %93, %95 : vector<2x128xf32>
    %97 = vector.extract_strided_slice %96 {offsets = [0, 0], sizes = [2, 32], strides = [1, 1]} : vector<2x128xf32> to vector<2x32xf32>
    %98 = arith.negf %97 : vector<2x32xf32>
    %99 = math.exp %98 : vector<2x32xf32>
    %cst_55 = arith.constant 1.000000e+00 : f32
    %100 = vector.broadcast %cst_55 : f32 to vector<2x32xf32>
    %101 = arith.addf %100, %99 : vector<2x32xf32>
    %102 = arith.divf %100, %101 : vector<2x32xf32>
    %103 = vector.extract_strided_slice %96 {offsets = [0, 32], sizes = [2, 32], strides = [1, 1]} : vector<2x128xf32> to vector<2x32xf32>
    %104 = arith.negf %103 : vector<2x32xf32>
    %105 = math.exp %104 : vector<2x32xf32>
    %cst_56 = arith.constant 1.000000e+00 : f32
    %106 = vector.broadcast %cst_56 : f32 to vector<2x32xf32>
    %107 = arith.addf %106, %105 : vector<2x32xf32>
    %108 = arith.divf %106, %107 : vector<2x32xf32>
    %109 = vector.extract_strided_slice %96 {offsets = [0, 64], sizes = [2, 32], strides = [1, 1]} : vector<2x128xf32> to vector<2x32xf32>
    %110 = math.tanh %109 : vector<2x32xf32>
    %111 = vector.extract_strided_slice %96 {offsets = [0, 96], sizes = [2, 32], strides = [1, 1]} : vector<2x128xf32> to vector<2x32xf32>
    %112 = arith.negf %111 : vector<2x32xf32>
    %113 = math.exp %112 : vector<2x32xf32>
    %cst_57 = arith.constant 1.000000e+00 : f32
    %114 = vector.broadcast %cst_57 : f32 to vector<2x32xf32>
    %115 = arith.addf %114, %113 : vector<2x32xf32>
    %116 = arith.divf %114, %115 : vector<2x32xf32>
    %c0_58 = arith.constant 0 : index
    %c0_59 = arith.constant 0 : index
    %117 = vector.load %arg8[%c0_58, %c0_59] : memref<2x32xf32, #tpu.memory_space<vmem>>, vector<2x32xf32>
    %118 = arith.mulf %108, %117 : vector<2x32xf32>
    %119 = arith.mulf %102, %110 : vector<2x32xf32>
    %120 = arith.addf %118, %119 : vector<2x32xf32>
    %121 = math.tanh %120 : vector<2x32xf32>
    %122 = arith.mulf %116, %121 : vector<2x32xf32>
    %c0_60 = arith.constant 0 : index
    %c0_61 = arith.constant 0 : index
    %123 = vector.load %arg8[%c0_60, %c0_61] : memref<2x32xf32, #tpu.memory_space<vmem>>, vector<2x32xf32>
    tpu.vector_store %arg8[%c0_60, %c0_61], %120 {strides = array<i32>} : memref<2x32xf32, #tpu.memory_space<vmem>>, vector<2x32xf32>,
    %c0_62 = arith.constant 0 : index
    %c0_63 = arith.constant 0 : index
    %124 = vector.load %arg7[%c0_62, %c0_63] : memref<2x32xf32, #tpu.memory_space<vmem>>, vector<2x32xf32>
    tpu.vector_store %arg7[%c0_62, %c0_63], %122 {strides = array<i32>} : memref<2x32xf32, #tpu.memory_space<vmem>>, vector<2x32xf32>,
    %c0_64 = arith.constant 0 : index
    %c0_65 = arith.constant 0 : index
    %125 = arith.index_cast %91 : i32 to index
    %c0_66 = arith.constant 0 : index
    %126 = vector.load %arg6[%c0_64, %c0_65, %125, %c0_66] : memref<1x1x8x32xf32, #tpu.memory_space<vmem>>, vector<1x1x2x32xf32>
    %127 = vector.shape_cast %126 : vector<1x1x2x32xf32> to vector<2x32xf32>
    %128 = vector.shape_cast %122 : vector<2x32xf32> to vector<1x1x2x32xf32>
    tpu.vector_store %arg6[%c0_64, %c0_65, %125, %c0_66], %128 {strides = array<i32>} : memref<1x1x8x32xf32, #tpu.memory_space<vmem>>, vector<1x1x2x32xf32>,
    %c3_i32 = arith.constant 3 : i32
    %c2_i32_67 = arith.constant 2 : i32
    %129 = arith.muli %c3_i32, %c2_i32_67 : i32
    %130 = arith.index_cast %129 : i32 to index
    %c0_68 = arith.constant 0 : index
    %131 = vector.load %arg9[%130, %c0_68] : memref<8x128xf32, #tpu.memory_space<vmem>>, vector<2x128xf32>
    %c0_69 = arith.constant 0 : index
    %c0_70 = arith.constant 0 : index
    %132 = vector.load %arg7[%c0_69, %c0_70] : memref<2x32xf32, #tpu.memory_space<vmem>>, vector<2x32xf32>
    %cst_71 = arith.constant dense<0.000000e+00> : vector<2x128xf32>
    %133 = tpu.matmul %132, %14, %cst_71 {dimension_numbers = #tpu.dot_dimension_numbers<[1], [0], [0], [1], [0, 0, 1, 1], [], []>} : vector<2x32xf32>, vector<32x128xf32>, vector<2x128xf32> -> vector<2x128xf32>
    %134 = arith.addf %131, %133 : vector<2x128xf32>
    %135 = vector.extract_strided_slice %134 {offsets = [0, 0], sizes = [2, 32], strides = [1, 1]} : vector<2x128xf32> to vector<2x32xf32>
    %136 = arith.negf %135 : vector<2x32xf32>
    %137 = math.exp %136 : vector<2x32xf32>
    %cst_72 = arith.constant 1.000000e+00 : f32
    %138 = vector.broadcast %cst_72 : f32 to vector<2x32xf32>
    %139 = arith.addf %138, %137 : vector<2x32xf32>
    %140 = arith.divf %138, %139 : vector<2x32xf32>
    %141 = vector.extract_strided_slice %134 {offsets = [0, 32], sizes = [2, 32], strides = [1, 1]} : vector<2x128xf32> to vector<2x32xf32>
    %142 = arith.negf %141 : vector<2x32xf32>
    %143 = math.exp %142 : vector<2x32xf32>
    %cst_73 = arith.constant 1.000000e+00 : f32
    %144 = vector.broadcast %cst_73 : f32 to vector<2x32xf32>
    %145 = arith.addf %144, %143 : vector<2x32xf32>
    %146 = arith.divf %144, %145 : vector<2x32xf32>
    %147 = vector.extract_strided_slice %134 {offsets = [0, 64], sizes = [2, 32], strides = [1, 1]} : vector<2x128xf32> to vector<2x32xf32>
    %148 = math.tanh %147 : vector<2x32xf32>
    %149 = vector.extract_strided_slice %134 {offsets = [0, 96], sizes = [2, 32], strides = [1, 1]} : vector<2x128xf32> to vector<2x32xf32>
    %150 = arith.negf %149 : vector<2x32xf32>
    %151 = math.exp %150 : vector<2x32xf32>
    %cst_74 = arith.constant 1.000000e+00 : f32
    %152 = vector.broadcast %cst_74 : f32 to vector<2x32xf32>
    %153 = arith.addf %152, %151 : vector<2x32xf32>
    %154 = arith.divf %152, %153 : vector<2x32xf32>
    %c0_75 = arith.constant 0 : index
    %c0_76 = arith.constant 0 : index
    %155 = vector.load %arg8[%c0_75, %c0_76] : memref<2x32xf32, #tpu.memory_space<vmem>>, vector<2x32xf32>
    %156 = arith.mulf %146, %155 : vector<2x32xf32>
    %157 = arith.mulf %140, %148 : vector<2x32xf32>
    %158 = arith.addf %156, %157 : vector<2x32xf32>
    %159 = math.tanh %158 : vector<2x32xf32>
    %160 = arith.mulf %154, %159 : vector<2x32xf32>
    %c0_77 = arith.constant 0 : index
    %c0_78 = arith.constant 0 : index
    %161 = vector.load %arg8[%c0_77, %c0_78] : memref<2x32xf32, #tpu.memory_space<vmem>>, vector<2x32xf32>
    tpu.vector_store %arg8[%c0_77, %c0_78], %158 {strides = array<i32>} : memref<2x32xf32, #tpu.memory_space<vmem>>, vector<2x32xf32>,
    %c0_79 = arith.constant 0 : index
    %c0_80 = arith.constant 0 : index
    %162 = vector.load %arg7[%c0_79, %c0_80] : memref<2x32xf32, #tpu.memory_space<vmem>>, vector<2x32xf32>
    tpu.vector_store %arg7[%c0_79, %c0_80], %160 {strides = array<i32>} : memref<2x32xf32, #tpu.memory_space<vmem>>, vector<2x32xf32>,
    %c0_81 = arith.constant 0 : index
    %c0_82 = arith.constant 0 : index
    %163 = arith.index_cast %129 : i32 to index
    %c0_83 = arith.constant 0 : index
    %164 = vector.load %arg6[%c0_81, %c0_82, %163, %c0_83] : memref<1x1x8x32xf32, #tpu.memory_space<vmem>>, vector<1x1x2x32xf32>
    %165 = vector.shape_cast %164 : vector<1x1x2x32xf32> to vector<2x32xf32>
    %166 = vector.shape_cast %160 : vector<2x32xf32> to vector<1x1x2x32xf32>
    tpu.vector_store %arg6[%c0_81, %c0_82, %163, %c0_83], %166 {strides = array<i32>} : memref<1x1x8x32xf32, #tpu.memory_space<vmem>>, vector<1x1x2x32xf32>,
    %c4_i32 = arith.constant 4 : i32
    return
  }
  func.func @transform_0(%arg0: i32, %arg1: i32) -> (i32, i32, i32, i32) {
    %c0_i32 = arith.constant 0 : i32
    %c0_i32_0 = arith.constant 0 : i32
    %c0_i32_1 = arith.constant 0 : i32
    return %arg0, %arg1, %c0_i32, %c0_i32_0 : i32, i32, i32, i32
  }
  func.func @transform_1(%arg0: i32, %arg1: i32) -> (i32, i32, i32) {
    %c0_i32 = arith.constant 0 : i32
    %c0_i32_0 = arith.constant 0 : i32
    %c0_i32_1 = arith.constant 0 : i32
    return %arg0, %c0_i32, %c0_i32_0 : i32, i32, i32
  }
  func.func @transform_2(%arg0: i32, %arg1: i32) -> (i32, i32, i32) {
    %c0_i32 = arith.constant 0 : i32
    %c0_i32_0 = arith.constant 0 : i32
    %c0_i32_1 = arith.constant 0 : i32
    return %arg0, %c0_i32, %c0_i32_0 : i32, i32, i32
  }
  func.func @transform_3(%arg0: i32, %arg1: i32) -> (i32, i32, i32) {
    %c0_i32 = arith.constant 0 : i32
    %c0_i32_0 = arith.constant 0 : i32
    %c0_i32_1 = arith.constant 0 : i32
    return %arg0, %c0_i32, %c0_i32_0 : i32, i32, i32
  }
  func.func @transform_4(%arg0: i32, %arg1: i32) -> (i32, i32, i32, i32) {
    %c0_i32 = arith.constant 0 : i32
    %c0_i32_0 = arith.constant 0 : i32
    %c0_i32_1 = arith.constant 0 : i32
    return %arg0, %arg1, %c0_i32, %c0_i32_0 : i32, i32, i32, i32
  }
}

</mosaic_0001>

<bundles_post_ra>
// kernel: pblstm_pad_forward.1
= control target key start
LH: loop header
LB: loop body
LE: loop exit
PB: predicated region body
PF: predicated region fallthrough
CT: control target
= control target key end

     0   :  { %s1178_s15 = smov 0   ;;  %s1180_s16 = smov 0   ;;  %s1311_s0 = inlined_call_operand.vmem [shape: f32[2,1,8,8], index: 0, kind: input, shape index: {}]   ;;  %s1312_s1 = inlined_call_operand.vmem [shape: f32[2,8,128], index: 1, kind: input, shape index: {}]   ;;  %s1313_s2 = inlined_call_operand.vmem [shape: f32[2,32,128], index: 2, kind: input, shape index: {}]   ;;  %s1314_s3 = inlined_call_operand.vmem [shape: f32[2,1,128], index: 3, kind: input, shape index: {}]   ;;  %s1315_s4 = inlined_call_operand.vmem [shape: f32[2,1,8,32], index: 4, kind: output, shape index: {}]  }
   0x1   :  { %s1182_s17 = smov 0  }
   0x2 LB: > { %s26_s18 = sadd.s32 1, %s1141_s16  ;;  %p947_p0 = scmp.ge.s32.totalorder %s1145_s17, 1  ;;  %s1145_s17 = sphi %s1182_s17, %s14_s17   ;;  %s1141_s16 = sphi %s1180_s16, %s1317_s16   ;;  %s1137_s15 = sphi %s1178_s15, %s1316_s15  }
   0x3   : > { %p28_p1 = scmp.ge.s32.totalorder %s26_s18, 2  ;;  %p207_p2 = scmp.lt.s32.totalorder %s1145_s17, 3 }
   0x5   : > { %s1319_s18 = smov (%p28_p1, %s26_s18), 0  ;;  %p208_p3 = pnand %p947_p0, %p207_p2 }
   0x6   : > { %vm279_vm0 = vcmask (!%p208_p3), 254976   ;;  %p249_p4 = scmp.lt.s32.totalorder (!%p208_p3), %s1137_s15, 1  ;;  %v1147_v0 = vmov (!%p208_p3), 0.0   ;;  %vm1148_vm1 = vmmov (!%p208_p3), 0   ;;  %v1149_v1 = vmov (!%p208_p3), 0.0|0.0   ;;  %s1150_s7 = smov (!%p208_p3), 64  }
   0x7   : > { %211 = sbr.rel (%p208_p3) target bundleno = 2863 (0xb2f), region = 36  ;;  %280 = vst.msk [vmem:[#allocation2] sm:$0x3] (!%p208_p3), %vm279_vm0, %v1147_v0  ;;  %281 = vst.msk [vmem:[#allocation3] sm:$0x3] (!%p208_p3), %vm279_vm0, %v1147_v0  ;;  %988 = vmatprep.subr.mxu0 (!%p208_p3), %v1147_v0  ;;  %990 = vmatprep.mubr.msk.f32.mxu0 (!%p208_p3), %vm1148_vm1, %v1147_v0  ;;  %vm291_vm2 = vcmask (!%p208_p3), 64512  }
   0x8   : > { %1037 = vmatprep.subr.bf16.mxu1 (!%p208_p3), %v1149_v1  ;;  %1001 = vmatprep.mubr.msk.f32.mxu1 (!%p208_p3), %vm1148_vm1, %v1147_v0  ;;  %vm372_vm3 = vcmask (!%p208_p3), 261120   ;;  %s1151_s8 = smov (!%p208_p3), 32   ;;  %s1152_s9 = smov (!%p208_p3), 96  }
   0xe   : > { %s1321_s15 = smov (!%p249_p4, %s1137_s15), 1  ;;  %v371_v10 = vld [vmem:[#allocation2] sm:$0x3]  ;;  %v454_v20 = vld [vmem:[#allocation3] sm:$0x3] }
   0xf   : > { %s1209_s19 = sshll.u32 %s1321_s15, 3  ;;  %s965_s20 = sshll.u32 %s1321_s15, 5 }
  0x10   : > { %s259_s23 = scalar_lea.vmem %s1312_s1, %s1209_s19  ;;  %s264_s26 = scalar_lea.vmem %s1313_s2, %s965_s20 }
  0x11   : > { %v283_v2 = vld [vmem:[%s259_s23] sm:$0xff]  ;;  %s255_s29 = scalar_lea.vmem %s1311_s0, %s1209_s19  ;;  %v367_v4 = vld [vmem:[%s264_s26 + $0x8] sm:$0xff]  ;;  %v368_v7 = vld [vmem:[%s264_s26 + $0x10] sm:$0xff]  ;;  %s267_s6 = scalar_lea.vmem %s1314_s3, %s1321_s15 }
  0x12   : > { %v366_v3 = vld [vmem:[%s264_s26] sm:$0xff]  ;;  %989 = vmatpush3.msra.mxu0 %v283_v2  ;;  %v369_v8 = vld [vmem:[%s264_s26 + $0x18] sm:$0xff]  ;;  %s1260_s12 = scalar_lea.vmem %s1315_s4, %s1209_s19 }
  0x13   : > { %v282_v5 = vld [vmem:[%s255_s29] sm:$0xff]  ;;  %v1223_v6 = vpack.c.bf16 %v367_v4, %v366_v3  ;;  %1043 = vmatprep.subr.bf16.mxu0 %v1149_v1  ;;  %v1227_v9 = vpack.c.bf16 %v369_v8, %v368_v7 }
  0x14   : > { %991 = vmatmul.mubr.msk.f32.vlgmr.msra.gmra.mrb[0].mxu0 %vm291_vm2, %v282_v5  ;;  %v953_v11 = vld [vmem:[%s267_s6] ss:$0 sm:$0xff] }
  0x15   : > { %1039 = vmatpush3.bf16.msra.mxu1 %v1223_v6  ;;  %1045 = vmatpush3.bf16.msra.mxu0 %v1223_v6 }
  0x16   : > { %1040 = vmatprep.subr.bf16.mxu1 %v1149_v1  ;;  %1046 = vmatprep.subr.bf16.mxu0 %v1149_v1 }
  0x17   : > { %1012 = vmatprep.mubr.msk.f32.mxu0 %vm1148_vm1, %v1147_v0 }
  0x19   : > { %1042 = vmatpush3.bf16.msra.mxu1 %v1227_v9  ;;  %1048 = vmatpush3.bf16.msra.mxu0 %v1227_v9 }
  0x1a   : > { %1049 = vmatprep.subr.bf16.mxu1 %v1149_v1  ;;  %1055 = vmatprep.subr.bf16.mxu0 %v1149_v1 }
  0x1c   : > { %1002 = vmatmul.mubr.msk.f32.vlgmr.msra.gmra.mrb[0].mxu1 %vm372_vm3, %v371_v10 }
  0x1d   : > { %1051 = vmatpush3.bf16.msra.mxu1 %v1223_v6  ;;  %1023 = vmatprep.mubr.msk.f32.mxu1 %vm1148_vm1, %v1147_v0 }
  0x1e   : > { %1052 = vmatprep.subr.bf16.mxu1 %v1149_v1 }
  0x21   : > { %1054 = vmatpush3.bf16.msra.mxu1 %v1227_v9 }
  0xe7   : > { %v361_v12 = vpop.f32.mrb[0].mxu0 }
  0xe8   : > { %v362_v13 = vadd.f32 %v953_v11, %v361_v12  ;;  %v992_v14 = vpop.f32.mrb[1].mxu0 }
  0xea   : > { %365 = vst [vmem:[#allocation4] sm:$0xff] %v362_v13 }
  0xef   : > { %v442_v15 = vpop.f32.mrb[0].mxu1 }
  0xf0   : > { %v1003_v16 = vpop.f32.mrb[1].mxu1 }
  0xf1   : > { %v370_v17 = vld [vmem:[#allocation4] sm:$0x3]  ;;  %v488_v38 = vld [vmem:[#allocation4 + $0x2] sm:$0x3]  ;;  %v604_v60 = vld [vmem:[#allocation4 + $0x4] sm:$0x3] }
  0xf2   : > { %v446_v18 = vadd.f32 %v442_v15, %v370_v17 }
  0xf4   : > { %1091 = vtanh.f32 %v446_v18  ;;  %v956_v21 = vmul.f32 -1.442695, %v446_v18  ;;  %v720_v18 = vld [vmem:[#allocation4 + $0x6] sm:$0x3] }
  0xf6   : > { %1093 = vpow2.f32 %v956_v21 }
  0xfe   : > { %v1092_v19 = vpop.eup %1091 }
  0xff   : > { %461 = vrot.lane.b32.xlu0 %v1092_v19, %s1150_s7 }
 0x100   : > { %v1094_v22 = vpop.eup %1093 }
 0x101   : > { %v450_v23 = vadd.f32 1.0, %v1094_v22 }
 0x103   : > { %456 = vrot.lane.b32.xlu0 %v454_v20, %s1151_s8  ;;  %1095 = vrcp.f32 %v450_v23 }
 0x10d   : > { %v1096_v24 = vpop.eup %1095 }
 0x171   : > { %v462_v25 = vpop.permute.xlu0 %461 }
 0x172   : > { %v464_v26 = vmul.f32 %v1096_v24, %v462_v25 }
 0x174   : > { %466 = vrot.lane.b32.xlu1 %v464_v26, %s1151_s8 }
 0x175   : > { %v457_v27 = vpop.permute.xlu0 %456 }
 0x176   : > { %v459_v28 = vmul.f32 %v1096_v24, %v457_v27 }
 0x1e6   : > { %v467_v29 = vpop.permute.xlu1 %466 }
 0x1e7   : > { %v469_v30 = vadd.f32 %v467_v29, %v459_v28 }
 0x1e9   : > { %1097 = vtanh.f32 %v469_v30 }
 0x1f3   : > { %v1098_v31 = vpop.eup %1097 }
 0x1f4   : > { %472 = vrot.lane.b32.xlu1 %v1098_v31, %s1150_s7 }
 0x1f8   : > { %477 = vrot.lane.b32.xlu1 %v469_v30, %s1152_s9 }
 0x266   : > { %v473_v32 = vpop.permute.xlu1 %472 }
 0x267   : > { %v475_v33 = vmul.f32 %v1096_v24, %v473_v32 }
 0x269   : > { %483 = vrot.lane.b32.xlu0 %v475_v33, %s1151_s8 }
 0x26a   : > { %v478_v34 = vpop.permute.xlu1 %477 }
 0x26b   : > { %481 = vst.msk [vmem:[#allocation3] sm:$0x3] %vm279_vm0, %v478_v34 }
 0x272   : > { %v571_v35 = vld [vmem:[#allocation3] sm:$0x3] }
 0x273   : > { %573 = vrot.lane.b32.xlu1 %v571_v35, %s1151_s8 }
 0x2db   : > { %v484_v36 = vpop.permute.xlu0 %483 }
 0x2dc   : > { %486 = vst.msk [vmem:[#allocation2] sm:$0x3] %vm279_vm0, %v484_v36  ;;  %487 = vst.msk [vmem:[%s1260_s12] sm:$0x3] %vm279_vm0, %v484_v36 }
 0x2e3   : > { %v489_v37 = vld [vmem:[#allocation2] sm:$0x3] }
 0x2e4   : > { %1013 = vmatmul.mubr.msk.f32.vlgmr.msra.gmra.mrb[2].mxu0 %vm372_vm3, %v489_v37 }
 0x2e5   : > { %1057 = vmatpush3.bf16.msra.mxu0 %v1223_v6  ;;  %1034 = vmatprep.mubr.msk.f32.mxu0 %vm1148_vm1, %v1147_v0  ;;  %v574_v49 = vpop.permute.xlu1 %573 }
 0x2e6   : > { %1058 = vmatprep.subr.bf16.mxu0 %v1149_v1 }
 0x2e9   : > { %1060 = vmatpush3.bf16.msra.mxu0 %v1227_v9 }
 0x3b7   : > { %v559_v39 = vpop.f32.mrb[2].mxu0 }
 0x3b8   : > { %v563_v40 = vadd.f32 %v559_v39, %v488_v38  ;;  %v1014_v41 = vpop.f32.mrb[3].mxu0 }
 0x3ba   : > { %1099 = vtanh.f32 %v563_v40  ;;  %v958_v43 = vmul.f32 -1.442695, %v563_v40 }
 0x3bc   : > { %1101 = vpow2.f32 %v958_v43 }
 0x3c4   : > { %v1100_v42 = vpop.eup %1099 }
 0x3c5   : > { %578 = vrot.lane.b32.xlu0 %v1100_v42, %s1150_s7 }
 0x3c6   : > { %v1102_v44 = vpop.eup %1101 }
 0x3c7   : > { %v567_v45 = vadd.f32 1.0, %v1102_v44 }
 0x3c9   : > { %1103 = vrcp.f32 %v567_v45 }
 0x3d3   : > { %v1104_v46 = vpop.eup %1103 }
 0x3d4   : > { %v576_v50 = vmul.f32 %v1104_v46, %v574_v49 }
 0x437   : > { %v579_v47 = vpop.permute.xlu0 %578 }
 0x438   : > { %v581_v48 = vmul.f32 %v1104_v46, %v579_v47 }
 0x43a   : > { %583 = vrot.lane.b32.xlu0 %v581_v48, %s1151_s8 }
 0x4ac   : > { %v584_v51 = vpop.permute.xlu0 %583 }
 0x4ad   : > { %v586_v52 = vadd.f32 %v584_v51, %v576_v50 }
 0x4af   : > { %1105 = vtanh.f32 %v586_v52 }
 0x4b9   : > { %v1106_v53 = vpop.eup %1105 }
 0x4ba   : > { %589 = vrot.lane.b32.xlu1 %v1106_v53, %s1150_s7 }
 0x4be   : > { %594 = vrot.lane.b32.xlu1 %v586_v52, %s1152_s9 }
 0x52c   : > { %v590_v54 = vpop.permute.xlu1 %589 }
 0x52d   : > { %v592_v55 = vmul.f32 %v1104_v46, %v590_v54 }
 0x52f   : > { %599 = vrot.lane.b32.xlu0 %v592_v55, %s1151_s8 }
 0x530   : > { %v595_v56 = vpop.permute.xlu1 %594 }
 0x531   : > { %597 = vst.msk [vmem:[#allocation3] sm:$0x3] %vm279_vm0, %v595_v56 }
 0x538   : > { %v687_v57 = vld [vmem:[#allocation3] sm:$0x3] }
 0x539   : > { %689 = vrot.lane.b32.xlu1 %v687_v57, %s1151_s8 }
 0x5a1   : > { %v600_v58 = vpop.permute.xlu0 %599 }
 0x5a2   : > { %602 = vst.msk [vmem:[#allocation2] sm:$0x3] %vm279_vm0, %v600_v58  ;;  %603 = vst.msk [vmem:[%s1260_s12 + $0x2] sm:$0x3] %vm279_vm0, %v600_v58 }
 0x5a9   : > { %v605_v59 = vld [vmem:[#allocation2] sm:$0x3] }
 0x5aa   : > { %1024 = vmatmul.mubr.msk.f32.vlgmr.msra.gmra.mrb[2].mxu1 %vm372_vm3, %v605_v59 }
 0x5ab   : > { %v690_v7 = vpop.permute.xlu1 %689 }
 0x67d   : > { %v675_v61 = vpop.f32.mrb[2].mxu1 }
 0x67e   : > { %v679_v62 = vadd.f32 %v675_v61, %v604_v60  ;;  %v1025_v63 = vpop.f32.mrb[3].mxu1 }
 0x680   : > { %1107 = vtanh.f32 %v679_v62  ;;  %v960_v1 = vmul.f32 -1.442695, %v679_v62 }
 0x682   : > { %1109 = vpow2.f32 %v960_v1 }
 0x68a   : > { %v1108_v0 = vpop.eup %1107 }
 0x68b   : > { %694 = vrot.lane.b32.xlu0 %v1108_v0, %s1150_s7 }
 0x68c   : > { %v1110_v2 = vpop.eup %1109 }
 0x68d   : > { %v683_v3 = vadd.f32 1.0, %v1110_v2 }
 0x68f   : > { %1111 = vrcp.f32 %v683_v3 }
 0x699   : > { %v1112_v4 = vpop.eup %1111 }
 0x69a   : > { %v692_v8 = vmul.f32 %v1112_v4, %v690_v7 }
 0x6fd   : > { %v695_v5 = vpop.permute.xlu0 %694 }
 0x6fe   : > { %v697_v6 = vmul.f32 %v1112_v4, %v695_v5 }
 0x700   : > { %699 = vrot.lane.b32.xlu0 %v697_v6, %s1151_s8 }
 0x772   : > { %v700_v9 = vpop.permute.xlu0 %699 }
 0x773   : > { %v702_v10 = vadd.f32 %v700_v9, %v692_v8 }
 0x775   : > { %1113 = vtanh.f32 %v702_v10 }
 0x77f   : > { %v1114_v11 = vpop.eup %1113 }
 0x780   : > { %705 = vrot.lane.b32.xlu1 %v1114_v11, %s1150_s7 }
 0x784   : > { %710 = vrot.lane.b32.xlu1 %v702_v10, %s1152_s9 }
 0x7f2   : > { %v706_v12 = vpop.permute.xlu1 %705 }
 0x7f3   : > { %v708_v13 = vmul.f32 %v1112_v4, %v706_v12 }
 0x7f5   : > { %715 = vrot.lane.b32.xlu0 %v708_v13, %s1151_s8 }
 0x7f6   : > { %v711_v14 = vpop.permute.xlu1 %710 }
 0x7f7   : > { %713 = vst.msk [vmem:[#allocation3] sm:$0x3] %vm279_vm0, %v711_v14 }
 0x7fe   : > { %v803_v15 = vld [vmem:[#allocation3] sm:$0x3] }
 0x7ff   : > { %805 = vrot.lane.b32.xlu1 %v803_v15, %s1151_s8 }
 0x867   : > { %v716_v16 = vpop.permute.xlu0 %715 }
 0x868   : > { %718 = vst.msk [vmem:[#allocation2] sm:$0x3] %vm279_vm0, %v716_v16  ;;  %719 = vst.msk [vmem:[%s1260_s12 + $0x4] sm:$0x3] %vm279_vm0, %v716_v16 }
 0x86f   : > { %v721_v17 = vld [vmem:[#allocation2] sm:$0x3] }
 0x870   : > { %1035 = vmatmul.mubr.msk.f32.vlgmr.msra.gmra.mrb[4].mxu0 %vm372_vm3, %v721_v17 }
 0x871   : > { %v806_v29 = vpop.permute.xlu1 %805 }
 0x943   : > { %v791_v19 = vpop.f32.mrb[4].mxu0 }
 0x944   : > { %v795_v20 = vadd.f32 %v791_v19, %v720_v18  ;;  %v1036_v21 = vpop.f32.mrb[5].mxu0 }
 0x946   : > { %1115 = vtanh.f32 %v795_v20  ;;  %v962_v23 = vmul.f32 -1.442695, %v795_v20 }
 0x948   : > { %1117 = vpow2.f32 %v962_v23 }
 0x950   : > { %v1116_v22 = vpop.eup %1115 }
 0x951   : > { %810 = vrot.lane.b32.xlu0 %v1116_v22, %s1150_s7 }
 0x952   : > { %v1118_v24 = vpop.eup %1117 }
 0x953   : > { %v799_v25 = vadd.f32 1.0, %v1118_v24 }
 0x955   : > { %1119 = vrcp.f32 %v799_v25 }
 0x95f   : > { %v1120_v26 = vpop.eup %1119 }
 0x960   : > { %v808_v30 = vmul.f32 %v1120_v26, %v806_v29 }
 0x9c3   : > { %v811_v27 = vpop.permute.xlu0 %810 }
 0x9c4   : > { %v813_v28 = vmul.f32 %v1120_v26, %v811_v27 }
 0x9c6   : > { %815 = vrot.lane.b32.xlu0 %v813_v28, %s1151_s8 }
 0xa38   : > { %v816_v31 = vpop.permute.xlu0 %815 }
 0xa39   : > { %v818_v32 = vadd.f32 %v816_v31, %v808_v30 }
 0xa3b   : > { %1121 = vtanh.f32 %v818_v32  ;;  %826 = vrot.lane.b32.xlu0 %v818_v32, %s1152_s9 }
 0xa45   : > { %v1122_v33 = vpop.eup %1121 }
 0xa46   : > { %821 = vrot.lane.b32.xlu1 %v1122_v33, %s1150_s7 }
 0xaad   : > { %v827_v34 = vpop.permute.xlu0 %826 }
 0xaae   : > { %829 = vst.msk [vmem:[#allocation3] sm:$0x3] %vm279_vm0, %v827_v34 }
 0xab8   : > { %v822_v35 = vpop.permute.xlu1 %821 }
 0xab9   : > { %v824_v36 = vmul.f32 %v1120_v26, %v822_v35 }
 0xabb   : > { %831 = vrot.lane.b32.xlu1 %v824_v36, %s1151_s8 }
 0xb2d   : > { %v832_v37 = vpop.permute.xlu1 %831 }
 0xb2e   : > { %834 = vst.msk [vmem:[#allocation2] sm:$0x3] %vm279_vm0, %v832_v37  ;;  %835 = vst.msk [vmem:[%s1260_s12 + $0x6] sm:$0x3] %vm279_vm0, %v832_v37 }
 0xb2f PF: > { %s14_s17 = sadd.s32 1, %s1145_s17   ;;  %s1316_s15 = smov %s1141_s16 }
 0xb30   : > { %p11_p5 = scmp.ge.s32.totalorder %s14_s17, 4   ;;  %s1317_s16 = smov %s1319_s18 }
 0xb32   :  { %13 = sbr.rel (!%p11_p5) target bundleno = 2 (0x2), region = 79 }

</bundles_post_ra>
